<compile_context>
chip_gen: v6e
topology: v6e:2x2x1
jax: 0.10.0
libtpu: 0.0.40
codegen_flags: <defaults>
</compile_context>

<pallas_src>
import functools

import jax
import jax.numpy as jnp
from jax.experimental import pallas as pl
from jax.experimental.pallas import tpu as pltpu

LANE = 128      # TPU lane width: keep every feature dim a multiple of this
SUBLANE = 8     # f32 sublane height: keep batch a multiple of this


def _round_up(n, m):
    return (n + m - 1) // m * m


# --------------------------------------------------------------------------
# Kernel
# --------------------------------------------------------------------------
def encoder_kernel(x_ref, h_ref,
                   w1_ref, b1_ref,
                   wg_ref, bg_ref,
                   wmv_ref, bmv_ref,
                   mv_ref, hout_ref):
    """Fused Encoder forward (fc1+relu -> GRUCell -> mean|var head)."""
    Hp = h_ref.shape[-1]

    x = x_ref[...]                       # (Bp, Ip)  bf16
    h = h_ref[...]                       # (Bp, Hp)  bf16

    # ---- fc1 + ReLU (bf16 in, f32 accumulate) -----------------------------
    x1 = jnp.dot(x, w1_ref[...], preferred_element_type=jnp.float32) + b1_ref[...]
    x1 = jnp.maximum(x1, 0.0)

    # ---- fused GRU gate matmul: one MXU pass ------------------------------
    # [x1 | h] @ Wg, Wg column blocks (each Hp wide, lane-aligned):
    #   [ Wir;Whr | Wiz;Whz | Win;0 | 0;Whn ]
    xh = jnp.concatenate([x1.astype(jnp.bfloat16), h], axis=-1)     # (Bp, 2Hp) bf16
    g = jnp.dot(xh, wg_ref[...], preferred_element_type=jnp.float32) + bg_ref[...]

    r = jax.nn.sigmoid(g[:, 0 * Hp:1 * Hp])
    z = jax.nn.sigmoid(g[:, 1 * Hp:2 * Hp])
    gi_n = g[:, 2 * Hp:3 * Hp]
    gh_n = g[:, 3 * Hp:4 * Hp]
    n = jnp.tanh(gi_n + r * gh_n)
    h_new = n + z * (h.astype(jnp.float32) - n)      # == (1-z)*n + z*h

    # ---- fused mean/var head: one matmul, one lane-dense store -------------
    mv_ref[...] = (jnp.dot(h_new.astype(jnp.bfloat16), wmv_ref[...],
                           preferred_element_type=jnp.float32) + bmv_ref[...])
    hout_ref[...] = h_new


# --------------------------------------------------------------------------
# Parameter preparation: pad to 128 lanes, fuse gate/head weights, cast bf16
# --------------------------------------------------------------------------
def prepare_params(params, input_dim, hidden_dim, output_dim):
    Ip = _round_up(input_dim, LANE)
    Hp = _round_up(hidden_dim, LANE)
    Op = _round_up(output_dim, LANE)
    H, O = hidden_dim, output_dim

    def pad2(a, rows, cols):
        return jnp.pad(a, ((0, rows - a.shape[0]), (0, cols - a.shape[1])))

    # fc1
    w1 = pad2(params["w1"], Ip, Hp)
    b1 = pad2(params["b1"], 1, Hp)

    # Fused GRU gate weight (2Hp, 4Hp): column blocks [r | z | gi_n | gh_n].
    wih, whh = params["wih"], params["whh"]          # (H, 3H) each
    bih, bhh = params["bih"], params["bhh"]          # (1, 3H) each
    wg = jnp.zeros((2 * Hp, 4 * Hp), jnp.float32)
    bg = jnp.zeros((1, 4 * Hp), jnp.float32)
    # r block (input + hidden paths, biases summed)
    wg = wg.at[:H,        0 * Hp:0 * Hp + H].set(wih[:, 0 * H:1 * H])
    wg = wg.at[Hp:Hp + H, 0 * Hp:0 * Hp + H].set(whh[:, 0 * H:1 * H])
    bg = bg.at[:, 0 * Hp:0 * Hp + H].set(bih[:, 0 * H:1 * H] + bhh[:, 0 * H:1 * H])
    # z block
    wg = wg.at[:H,        1 * Hp:1 * Hp + H].set(wih[:, 1 * H:2 * H])
    wg = wg.at[Hp:Hp + H, 1 * Hp:1 * Hp + H].set(whh[:, 1 * H:2 * H])
    bg = bg.at[:, 1 * Hp:1 * Hp + H].set(bih[:, 1 * H:2 * H] + bhh[:, 1 * H:2 * H])
    # gi_n block (input path only)
    wg = wg.at[:H,        2 * Hp:2 * Hp + H].set(wih[:, 2 * H:3 * H])
    bg = bg.at[:, 2 * Hp:2 * Hp + H].set(bih[:, 2 * H:3 * H])
    # gh_n block (hidden path only)
    wg = wg.at[Hp:Hp + H, 3 * Hp:3 * Hp + H].set(whh[:, 2 * H:3 * H])
    bg = bg.at[:, 3 * Hp:3 * Hp + H].set(bhh[:, 2 * H:3 * H])

    # Fused mean|var head (Hp, 2*Op): columns [mean | var].
    wmv = jnp.zeros((Hp, 2 * Op), jnp.float32)
    bmv = jnp.zeros((1, 2 * Op), jnp.float32)
    wmv = wmv.at[:H, :O].set(params["wm"])
    wmv = wmv.at[:H, Op:Op + O].set(params["wv"])
    bmv = bmv.at[:, :O].set(params["bm"])
    bmv = bmv.at[:, Op:Op + O].set(params["bv"])

    kparams = {
        "w1": w1.astype(jnp.bfloat16), "b1": b1,          # biases stay f32
        "wg": wg.astype(jnp.bfloat16), "bg": bg,
        "wmv": wmv.astype(jnp.bfloat16), "bmv": bmv,
    }
    dims = (input_dim, hidden_dim, output_dim, Ip, Hp, Op)
    return kparams, dims


# --------------------------------------------------------------------------
# Forward wrapper
# --------------------------------------------------------------------------
@functools.partial(jax.jit, static_argnames=("dims",))
def encoder_forward(x, hidden, kparams, dims):
    input_dim, H, O, Ip, Hp, Op = dims
    B = x.shape[0]
    Bp = _round_up(B, SUBLANE)

    xp = jnp.zeros((Bp, Ip), jnp.bfloat16).at[:B, :input_dim].set(
        x.astype(jnp.bfloat16))
    hp = jnp.zeros((Bp, Hp), jnp.bfloat16).at[:B, :H].set(
        hidden.astype(jnp.bfloat16))

    inputs = (xp, hp,
              kparams["w1"], kparams["b1"],
              kparams["wg"], kparams["bg"],
              kparams["wmv"], kparams["bmv"])
    vmem = pltpu.MemorySpace.VMEM

    mv, hout = pl.pallas_call(
        encoder_kernel,
        out_shape=(jax.ShapeDtypeStruct((Bp, 2 * Op), jnp.float32),
                   jax.ShapeDtypeStruct((Bp, Hp), jnp.float32)),
        in_specs=[pl.BlockSpec(memory_space=vmem) for _ in inputs],
        out_specs=(pl.BlockSpec(memory_space=vmem),
                   pl.BlockSpec(memory_space=vmem)),
        # TODO(synk): when scaling H/B up (weights-resident or multi-step RNN),
        # add a batch/time grid with dimension_semantics=("parallel",...) and
        # set pltpu.CompilerParams(vmem_limit_bytes=...) against the 64 MiB
        # v7x VMEM budget.
    )(*inputs)

    mean = mv[:B, :O]
    var = mv[:B, Op:Op + O]
    h_new = hout[:B, :H]
    return mean, var, h_new


# --------------------------------------------------------------------------
# Synthetic parameters (PyTorch shapes, stored pre-transposed as (in, out))
# --------------------------------------------------------------------------
def init_params(key, input_dim, hidden_dim, output_dim):
    ks = jax.random.split(key, 10)

    def u(k, shape, fan_in):
        bound = 1.0 / jnp.sqrt(fan_in)
        return jax.random.uniform(k, shape, jnp.float32, -bound, bound)

    return {
        "w1": u(ks[0], (input_dim, hidden_dim), input_dim),
        "b1": u(ks[1], (1, hidden_dim), input_dim),
        "wih": u(ks[2], (hidden_dim, 3 * hidden_dim), hidden_dim),
        "bih": u(ks[3], (1, 3 * hidden_dim), hidden_dim),
        "whh": u(ks[4], (hidden_dim, 3 * hidden_dim), hidden_dim),
        "bhh": u(ks[5], (1, 3 * hidden_dim), hidden_dim),
        "wm": u(ks[6], (hidden_dim, output_dim), hidden_dim),
        "bm": u(ks[7], (1, output_dim), hidden_dim),
        "wv": u(ks[8], (hidden_dim, output_dim), hidden_dim),
        "bv": u(ks[9], (1, output_dim), hidden_dim),
    }


# --------------------------------------------------------------------------
# Pure-JAX references
# --------------------------------------------------------------------------
def encoder_reference_f32(x, hidden, p):
    """Exact module semantics in f32."""
    H = hidden.shape[-1]
    x1 = jnp.maximum(x @ p["w1"] + p["b1"], 0.0)
    gi = x1 @ p["wih"] + p["bih"]
    gh = hidden @ p["whh"] + p["bhh"]
    r = jax.nn.sigmoid(gi[:, :H] + gh[:, :H])
    z = jax.nn.sigmoid(gi[:, H:2 * H] + gh[:, H:2 * H])
    n = jnp.tanh(gi[:, 2 * H:] + r * gh[:, 2 * H:])
    h_new = (1.0 - z) * n + z * hidden
    return h_new @ p["wm"] + p["bm"], h_new @ p["wv"] + p["bv"], h_new


def encoder_reference_bf16(x, hidden, p):
    """Same numerics as the kernel: bf16 matmul inputs, f32 accumulation."""
    H = hidden.shape[-1]
    bf = lambda a: a.astype(jnp.bfloat16)
    f32 = jnp.float32
    xb, hb = bf(x), bf(hidden)
    x1 = jnp.maximum(
        jnp.dot(xb, bf(p["w1"]), preferred_element_type=f32) + p["b1"], 0.0)
    x1b = bf(x1)
    gi = jnp.dot(x1b, bf(p["wih"]), preferred_element_type=f32) + p["bih"]
    gh = jnp.dot(hb, bf(p["whh"]), preferred_element_type=f32) + p["bhh"]
    r = jax.nn.sigmoid(gi[:, :H] + gh[:, :H])
    z = jax.nn.sigmoid(gi[:, H:2 * H] + gh[:, H:2 * H])
    n = jnp.tanh(gi[:, 2 * H:] + r * gh[:, 2 * H:])
    h_new = n + z * (hb.astype(f32) - n)
    hnb = bf(h_new)
    mean = jnp.dot(hnb, bf(p["wm"]), preferred_element_type=f32) + p["bm"]
    var = jnp.dot(hnb, bf(p["wv"]), preferred_element_type=f32) + p["bv"]
    return mean, var, h_new


if __name__ == "__main__":
    B, INPUT_DIM, HIDDEN_DIM, OUTPUT_DIM = 8, 32, 32, 16

    key = jax.random.PRNGKey(0)
    kx, kh, kp = jax.random.split(key, 3)
    x = jax.random.normal(kx, (B, INPUT_DIM), jnp.float32)
    hidden = jax.random.normal(kh, (B, HIDDEN_DIM), jnp.float32)
    params = init_params(kp, INPUT_DIM, HIDDEN_DIM, OUTPUT_DIM)
    kparams, dims = prepare_params(params, INPUT_DIM, HIDDEN_DIM, OUTPUT_DIM)

    mean, var, h = jax.block_until_ready(encoder_forward(x, hidden, kparams, dims))

    # Tight check vs a pure-JAX reference using identical bf16-in/f32-acc numerics.
    rm, rv, rh = encoder_reference_bf16(x, hidden, params)
    assert jnp.allclose(mean, rm, atol=1e-3, rtol=1e-3)
    assert jnp.allclose(var, rv, atol=1e-3, rtol=1e-3)
    assert jnp.allclose(h, rh, atol=1e-3, rtol=1e-3)

    # Loose check vs exact f32 module semantics (bf16 inputs cost ~1e-2).
    fm, fv, fh = encoder_reference_f32(x, hidden, params)
    assert jnp.allclose(mean, fm, atol=5e-2, rtol=5e-2)
    assert jnp.allclose(var, fv, atol=5e-2, rtol=5e-2)
    assert jnp.allclose(h, fh, atol=5e-2, rtol=5e-2)

    print("KERNEL_OK")
</pallas_src>

<mosaic_0001>
module attributes {stable_mosaic.version = 11 : i64} {
  func.func @encoder_kernel(%arg0: memref<8x128xbf16, #tpu.memory_space<vmem>>, %arg1: memref<8x128xbf16, #tpu.memory_space<vmem>>, %arg2: memref<128x128xbf16, #tpu.memory_space<vmem>>, %arg3: memref<1x128xf32, #tpu.memory_space<vmem>>, %arg4: memref<256x512xbf16, #tpu.memory_space<vmem>>, %arg5: memref<1x512xf32, #tpu.memory_space<vmem>>, %arg6: memref<128x256xbf16, #tpu.memory_space<vmem>>, %arg7: memref<1x256xf32, #tpu.memory_space<vmem>>, %arg8: memref<8x256xf32, #tpu.memory_space<vmem>>, %arg9: memref<8x128xf32, #tpu.memory_space<vmem>>) attributes {dimension_semantics = [], scalar_prefetch = 0 : i64, scratch_operands = 0 : i64, tpu.core_type = #tpu.core_type<tc>} {
    %c0 = arith.constant 0 : index
    %c0_0 = arith.constant 0 : index
    %0 = vector.load %arg0[%c0, %c0_0] : memref<8x128xbf16, #tpu.memory_space<vmem>>, vector<8x128xbf16>
    %c0_1 = arith.constant 0 : index
    %c0_2 = arith.constant 0 : index
    %1 = vector.load %arg1[%c0_1, %c0_2] : memref<8x128xbf16, #tpu.memory_space<vmem>>, vector<8x128xbf16>
    %c0_3 = arith.constant 0 : index
    %c0_4 = arith.constant 0 : index
    %2 = vector.load %arg2[%c0_3, %c0_4] : memref<128x128xbf16, #tpu.memory_space<vmem>>, vector<128x128xbf16>
    %cst = arith.constant dense<0.000000e+00> : vector<8x128xf32>
    %3 = tpu.matmul %0, %2, %cst {dimension_numbers = #tpu.dot_dimension_numbers<[1], [0], [0], [1], [0, 0, 1, 1], [], []>} : vector<8x128xbf16>, vector<128x128xbf16>, vector<8x128xf32> -> vector<8x128xf32>
    %c0_5 = arith.constant 0 : index
    %c0_6 = arith.constant 0 : index
    %4 = vector.load %arg3[%c0_5, %c0_6] : memref<1x128xf32, #tpu.memory_space<vmem>>, vector<1x128xf32>
    %5 = vector.broadcast %4 : vector<1x128xf32> to vector<8x128xf32>
    %6 = arith.addf %3, %5 : vector<8x128xf32>
    %cst_7 = arith.constant 0.000000e+00 : f32
    %7 = vector.broadcast %cst_7 : f32 to vector<8x128xf32>
    %8 = arith.maximumf %6, %7 : vector<8x128xf32>
    %9 = arith.truncf %8 : vector<8x128xf32> to vector<8x128xbf16>
    %10 = tpu.concatenate %9, %1 in 1 : vector<8x128xbf16>, vector<8x128xbf16> -> vector<8x256xbf16>
    %c0_8 = arith.constant 0 : index
    %c0_9 = arith.constant 0 : index
    %11 = vector.load %arg4[%c0_8, %c0_9] : memref<256x512xbf16, #tpu.memory_space<vmem>>, vector<256x512xbf16>
    %cst_10 = arith.constant dense<0.000000e+00> : vector<8x512xf32>
    %12 = tpu.matmul %10, %11, %cst_10 {dimension_numbers = #tpu.dot_dimension_numbers<[1], [0], [0], [1], [0, 0, 1, 1], [], []>} : vector<8x256xbf16>, vector<256x512xbf16>, vector<8x512xf32> -> vector<8x512xf32>
    %c0_11 = arith.constant 0 : index
    %c0_12 = arith.constant 0 : index
    %13 = vector.load %arg5[%c0_11, %c0_12] : memref<1x512xf32, #tpu.memory_space<vmem>>, vector<1x512xf32>
    %14 = vector.broadcast %13 : vector<1x512xf32> to vector<8x512xf32>
    %15 = arith.addf %12, %14 : vector<8x512xf32>
    %16 = vector.extract_strided_slice %15 {offsets = [0, 0], sizes = [8, 128], strides = [1, 1]} : vector<8x512xf32> to vector<8x128xf32>
    %17 = arith.negf %16 : vector<8x128xf32>
    %18 = math.exp %17 : vector<8x128xf32>
    %cst_13 = arith.constant 1.000000e+00 : f32
    %19 = vector.broadcast %cst_13 : f32 to vector<8x128xf32>
    %20 = arith.addf %19, %18 : vector<8x128xf32>
    %21 = arith.divf %19, %20 : vector<8x128xf32>
    %22 = vector.extract_strided_slice %15 {offsets = [0, 128], sizes = [8, 128], strides = [1, 1]} : vector<8x512xf32> to vector<8x128xf32>
    %23 = arith.negf %22 : vector<8x128xf32>
    %24 = math.exp %23 : vector<8x128xf32>
    %cst_14 = arith.constant 1.000000e+00 : f32
    %25 = vector.broadcast %cst_14 : f32 to vector<8x128xf32>
    %26 = arith.addf %25, %24 : vector<8x128xf32>
    %27 = arith.divf %25, %26 : vector<8x128xf32>
    %28 = vector.extract_strided_slice %15 {offsets = [0, 256], sizes = [8, 128], strides = [1, 1]} : vector<8x512xf32> to vector<8x128xf32>
    %29 = vector.extract_strided_slice %15 {offsets = [0, 384], sizes = [8, 128], strides = [1, 1]} : vector<8x512xf32> to vector<8x128xf32>
    %30 = arith.mulf %21, %29 : vector<8x128xf32>
    %31 = arith.addf %28, %30 : vector<8x128xf32>
    %32 = math.tanh %31 : vector<8x128xf32>
    %33 = arith.extf %1 : vector<8x128xbf16> to vector<8x128xf32>
    %34 = arith.subf %33, %32 : vector<8x128xf32>
    %35 = arith.mulf %27, %34 : vector<8x128xf32>
    %36 = arith.addf %32, %35 : vector<8x128xf32>
    %37 = arith.truncf %36 : vector<8x128xf32> to vector<8x128xbf16>
    %c0_15 = arith.constant 0 : index
    %c0_16 = arith.constant 0 : index
    %38 = vector.load %arg6[%c0_15, %c0_16] : memref<128x256xbf16, #tpu.memory_space<vmem>>, vector<128x256xbf16>
    %cst_17 = arith.constant dense<0.000000e+00> : vector<8x256xf32>
    %39 = tpu.matmul %37, %38, %cst_17 {dimension_numbers = #tpu.dot_dimension_numbers<[1], [0], [0], [1], [0, 0, 1, 1], [], []>} : vector<8x128xbf16>, vector<128x256xbf16>, vector<8x256xf32> -> vector<8x256xf32>
    %c0_18 = arith.constant 0 : index
    %c0_19 = arith.constant 0 : index
    %40 = vector.load %arg7[%c0_18, %c0_19] : memref<1x256xf32, #tpu.memory_space<vmem>>, vector<1x256xf32>
    %41 = vector.broadcast %40 : vector<1x256xf32> to vector<8x256xf32>
    %42 = arith.addf %39, %41 : vector<8x256xf32>
    %c0_20 = arith.constant 0 : index
    %c0_21 = arith.constant 0 : index
    %43 = vector.load %arg8[%c0_20, %c0_21] : memref<8x256xf32, #tpu.memory_space<vmem>>, vector<8x256xf32>
    tpu.vector_store %arg8[%c0_20, %c0_21], %42 {strides = array<i32>} : memref<8x256xf32, #tpu.memory_space<vmem>>, vector<8x256xf32>,
    %c0_22 = arith.constant 0 : index
    %c0_23 = arith.constant 0 : index
    %44 = vector.load %arg9[%c0_22, %c0_23] : memref<8x128xf32, #tpu.memory_space<vmem>>, vector<8x128xf32>
    tpu.vector_store %arg9[%c0_22, %c0_23], %36 {strides = array<i32>} : memref<8x128xf32, #tpu.memory_space<vmem>>, vector<8x128xf32>,
    return
  }
}

</mosaic_0001>

<bundles_post_ra>
// kernel: encoder_forward.1
= control target key start
LH: loop header
LB: loop body
LE: loop exit
PB: predicated region body
PF: predicated region fallthrough
CT: control target
= control target key end

     0   :  { %15 = vsyncpa [#allocation3], 0  ;;  %s1327_s0 = inlined_call_operand.vmem [shape: bf16[8,128], index: 0, kind: input, shape index: {}]   ;;  %s1328_s1 = inlined_call_operand.vmem [shape: bf16[8,128], index: 1, kind: input, shape index: {}]   ;;  %s1329_s2 = inlined_call_operand.hbm [shape: bf16[128,128], index: 2, kind: input, shape index: {}]   ;;  %s1330_s3 = inlined_call_operand.vmem [shape: f32[1,128], index: 3, kind: input, shape index: {}]   ;;  %s1331_s4 = inlined_call_operand.hbm [shape: bf16[256,512], index: 4, kind: input, shape index: {}]   ;;  %s1332_s5 = inlined_call_operand.vmem [shape: f32[1,512], index: 5, kind: input, shape index: {}]   ;;  %s1333_s6 = inlined_call_operand.hbm [shape: bf16[128,256], index: 6, kind: input, shape index: {}]   ;;  %s1334_s7 = inlined_call_operand.vmem [shape: f32[1,256], index: 7, kind: input, shape index: {}]   ;;  %s1335_s8 = inlined_call_operand.vmem [shape: f32[8,256], index: 8, kind: output, shape index: {0}]   ;;  %s1336_s9 = inlined_call_operand.hbm [shape: f32[8,128], index: 9, kind: output, shape index: {1}]  }
   0x1   :  { %16 = vsyncpa [#allocation6], 0 }
   0x2   :  { %17 = vsyncpa [#allocation4], 0  ;;  %s1226_s30 = smov [#allocation5]  }
   0x3   :  { %s41_s10 = sshll.u32 %s1226_s30, 4  ;;  %s42_s10 = int_to_ptr.vmem [resolvable:$true] %s41_s10 }
   0x4   :  { %s1148_s11 = scalar_lea.vmem %s42_s10, 8192  ;;  %p1153_p1 = scmp.lt.s32.totalorder %s42_s10, %s42_s10 }
   0x5   :  { %p1149_p0 = scmp.ne.s32.totalorder %s42_s10, %s1148_s11  ;;  %p1154_p2 = scmp.lt.s32.totalorder %s1148_s11, %s1148_s11 }
   0x7   :  { %p1155_p3 = por %p1154_p2, %p1153_p1 }
   0x9   :  { %p1156_p4 = pnand %p1155_p3, %p1149_p0 }
   0xb   :  { %1159 = shalt.err (!%p1156_p4)
}
   0xc   :  { %s1227_s12 = smov 256   ;;  %s1228_s13 = smov 16  }
   0xd   :  { %47 = dma.hbm_to_vmem [thread:$0]  %s1331_s4, 8192, %s42_s10, [#allocation6], %s1227_s12, %s1227_s12, %s1228_s13  }
   0xe   :  { %s1229_s16 = smov [#allocation2]  }
   0xf   :  { %s27_s17 = sshll.u32 %s1229_s16, 4  ;;  %s28_s17 = int_to_ptr.vmem [resolvable:$true] %s27_s17 }
  0x10   :  { %s1168_s18 = scalar_lea.vmem %s28_s17, 1024  ;;  %p1173_p6 = scmp.lt.s32.totalorder %s28_s17, %s28_s17 }
  0x11   :  { %p1169_p5 = scmp.ne.s32.totalorder %s28_s17, %s1168_s18  ;;  %p1174_p7 = scmp.lt.s32.totalorder %s1168_s18, %s1168_s18 }
  0x13   :  { %p1175_p8 = por %p1174_p7, %p1173_p6 }
  0x15   :  { %p1176_p9 = pnand %p1175_p8, %p1169_p5 }
  0x17   :  { %1179 = shalt.err (!%p1176_p9)
}
  0x18   :  { %s1230_s19 = smov 64   ;;  %s1231_s20 = smov 4  }
  0x19   :  { %33 = dma.hbm_to_vmem [thread:$0]  %s1329_s2, 1024, %s28_s17, [#allocation3], %s1230_s19, %s1230_s19, %s1231_s20  }
  0x1a   :  { %s1232_s23 = smov [#allocation7]  }
  0x1b   :  { %s55_s24 = sshll.u32 %s1232_s23, 4  ;;  %s56_s24 = int_to_ptr.vmem [resolvable:$true] %s55_s24 }
  0x1c   :  { %s1188_s4 = scalar_lea.vmem %s56_s24, 2048  ;;  %p1193_p11 = scmp.lt.s32.totalorder %s56_s24, %s56_s24 }
  0x1d   :  { %p1189_p10 = scmp.ne.s32.totalorder %s56_s24, %s1188_s4  ;;  %p1194_p12 = scmp.lt.s32.totalorder %s1188_s4, %s1188_s4 }
  0x1f   :  { %p1195_p13 = por %p1194_p12, %p1193_p11 }
  0x21   :  { %p1196_p0 = pnand %p1195_p13, %p1189_p10 }
  0x23   :  { %1199 = shalt.err (!%p1196_p0)
}
  0x24   :  { %s1233_s25 = smov 128   ;;  %s1234_s26 = smov 8  }
  0x25   :  { %61 = dma.hbm_to_vmem [thread:$0]  %s1333_s6, 2048, %s56_s24, [#allocation6], %s1233_s25, %s1233_s25, %s1234_s26  }
  0x26   :  { %1220 = dma.done.wait [#allocation3], 1024  }
  0x27   :  { %1221 = vsyncadd [#allocation3], 4294966272 }
  0x28   :  { %1222 = dma.done.wait [#allocation6], 10240  }
  0x29   :  { %1223 = vsyncadd [#allocation6], 4294957056  ;;  %v1235_v0 = vmov 0.0   ;;  %vm1236_vm0 = vmmov 0   ;;  %v1002_v1 = vld [vmem:[#allocation2 + $0x38] sm:$0xff]   ;;  %v1003_v2 = vld [vmem:[#allocation2 + $0x30] sm:$0xff]  }
  0x2a   :  { %969 = vmatprep.subr.bf16.mxu0 %v1235_v0  ;;  %985 = vmatprep.mubr.msk.bf16.mxu0 %vm1236_vm0, %v1235_v0  ;;  %v1004_v3 = vld [vmem:[#allocation2 + $0x28] sm:$0xff]   ;;  %v1010_v4 = vld [vmem:[#allocation5 + $0xe4] ss:$16 sps:$4 sm:$0xff]   ;;  %v1015_v6 = vld [vmem:[#allocation5 + $0xe0] ss:$16 sps:$4 sm:$0xff]  }
  0x2b   :  { %970 = vmatpush3.bf16.msra.mxu0 %v1002_v1  ;;  %v1005_v5 = vld [vmem:[#allocation2 + $0x20] sm:$0xff]   ;;  %595 = vmatprep.subr.bf16.mxu1 %v1010_v4  ;;  %v1006_v8 = vld [vmem:[#allocation2 + $0x18] sm:$0xff]   ;;  %v1007_v13 = vld [vmem:[#allocation2 + $0x10] sm:$0xff]  }
  0x2c   :  { %971 = vmatprep.subr.bf16.mxu0 %v1235_v0  ;;  %v1016_v7 = vld [vmem:[#allocation5 + $0xc4] ss:$16 sps:$4 sm:$0xff]   ;;  %596 = vmatpush1.bf16.msra.mxu1 %v1015_v6  ;;  %v1021_v9 = vld [vmem:[#allocation5 + $0xc0] ss:$16 sps:$4 sm:$0xff]   ;;  %v1008_v16 = vld [vmem:[#allocation2 + $0x8] sm:$0xff]  }
  0x2d   :  { %597 = vmatprep.subr.bf16.mxu1 %v1016_v7  ;;  %v1022_v10 = vld [vmem:[#allocation5 + $0xa4] ss:$16 sps:$4 sm:$0xff]   ;;  %v1027_v11 = vld [vmem:[#allocation5 + $0xa0] ss:$16 sps:$4 sm:$0xff]   ;;  %v1014_v20 = vld [vmem:[#allocation5 + $0xec] ss:$16 sps:$4 sm:$0xff]  }
  0x2e   :  { %v1028_v12 = vld [vmem:[#allocation5 + $0x84] ss:$16 sps:$4 sm:$0xff]   ;;  %v1033_v14 = vld [vmem:[#allocation5 + $0x80] ss:$16 sps:$4 sm:$0xff]   ;;  %v1012_v24 = vld [vmem:[#allocation5 + $0xe8] ss:$16 sps:$4 sm:$0xff]  }
  0x2f   :  { %972 = vmatpush3.bf16.msra.mxu0 %v1003_v2  ;;  %v1034_v15 = vld [vmem:[#allocation5 + $0x64] ss:$16 sps:$4 sm:$0xff]   ;;  %v1039_v17 = vld [vmem:[#allocation5 + $0x60] ss:$16 sps:$4 sm:$0xff]   ;;  %v1020_v25 = vld [vmem:[#allocation5 + $0xcc] ss:$16 sps:$4 sm:$0xff]  }
  0x30   :  { %973 = vmatprep.subr.bf16.mxu0 %v1235_v0  ;;  %598 = vmatpush1.bf16.msra.mxu1 %v1021_v9  ;;  %v1040_v18 = vld [vmem:[#allocation5 + $0x44] ss:$16 sps:$4 sm:$0xff]   ;;  %v1045_v21 = vld [vmem:[#allocation5 + $0x40] ss:$16 sps:$4 sm:$0xff]   ;;  %v1018_v28 = vld [vmem:[#allocation5 + $0xc8] ss:$16 sps:$4 sm:$0xff]  }
  0x31   :  { %599 = vmatprep.subr.bf16.mxu1 %v1022_v10  ;;  %v1009_v19 = vld [vmem:[#allocation2] sm:$0xff]   ;;  %v1026_v29 = vld [vmem:[#allocation5 + $0xac] ss:$16 sps:$4 sm:$0xff]   ;;  %v1024_v32 = vld [vmem:[#allocation5 + $0xa8] ss:$16 sps:$4 sm:$0xff]  }
  0x32   :  { %v74_v22 = vld [vmem:[%s1327_s0] sm:$0xf]  ;;  %v1046_v23 = vld [vmem:[#allocation5 + $0x24] ss:$16 sps:$4 sm:$0xff]   ;;  %v1032_v33 = vld [vmem:[#allocation5 + $0x8c] ss:$16 sps:$4 sm:$0xff]  }
  0x33   :  { %974 = vmatpush3.bf16.msra.mxu0 %v1004_v3  ;;  %v1051_v26 = vld [vmem:[#allocation5 + $0x20] ss:$16 sps:$4 sm:$0xff]   ;;  %v1052_v27 = vld [vmem:[#allocation5 + $0x4] ss:$16 sps:$4 sm:$0xff]   ;;  %v1030_v36 = vld [vmem:[#allocation5 + $0x88] ss:$16 sps:$4 sm:$0xff]  }
  0x34   :  { %975 = vmatprep.subr.bf16.mxu0 %v1235_v0  ;;  %600 = vmatpush1.bf16.msra.mxu1 %v1027_v11  ;;  %v1057_v30 = vld [vmem:[#allocation5] ss:$16 sps:$4 sm:$0xff]   ;;  %v1058_v31 = vld [vmem:[#allocation5 + $0x1e4] ss:$16 sps:$4 sm:$0xff]   ;;  %v1038_v37 = vld [vmem:[#allocation5 + $0x6c] ss:$16 sps:$4 sm:$0xff]  }
  0x35   :  { %601 = vmatprep.subr.bf16.mxu1 %v1028_v12  ;;  %v1063_v34 = vld [vmem:[#allocation5 + $0x1e0] ss:$16 sps:$4 sm:$0xff]   ;;  %v1064_v35 = vld [vmem:[#allocation5 + $0x1c4] ss:$16 sps:$4 sm:$0xff]   ;;  %v1036_v40 = vld [vmem:[#allocation5 + $0x68] ss:$16 sps:$4 sm:$0xff]  }
  0x36   :  { %v1069_v38 = vld [vmem:[#allocation5 + $0x1c0] ss:$16 sps:$4 sm:$0xff]   ;;  %v1070_v39 = vld [vmem:[#allocation5 + $0x1a4] ss:$16 sps:$4 sm:$0xff]   ;;  %v1044_v41 = vld [vmem:[#allocation5 + $0x4c] ss:$16 sps:$4 sm:$0xff]  }
  0x37   :  { %976 = vmatpush3.bf16.msra.mxu0 %v1005_v5  ;;  %v1075_v42 = vld [vmem:[#allocation5 + $0x1a0] ss:$16 sps:$4 sm:$0xff]   ;;  %v1042_v43 = vld [vmem:[#allocation5 + $0x48] ss:$16 sps:$4 sm:$0xff]   ;;  %v1076_v44 = vld [vmem:[#allocation5 + $0x184] ss:$16 sps:$4 sm:$0xff]  }
  0x38   :  { %977 = vmatprep.subr.bf16.mxu0 %v1235_v0  ;;  %602 = vmatpush1.bf16.msra.mxu1 %v1033_v14  ;;  %v1050_v45 = vld [vmem:[#allocation5 + $0x2c] ss:$16 sps:$4 sm:$0xff]   ;;  %v1081_v46 = vld [vmem:[#allocation5 + $0x180] ss:$16 sps:$4 sm:$0xff]   ;;  %v1082_v47 = vld [vmem:[#allocation5 + $0x164] ss:$16 sps:$4 sm:$0xff]  }
  0x39   :  { %603 = vmatprep.subr.bf16.mxu1 %v1034_v15  ;;  %v1048_v48 = vld [vmem:[#allocation5 + $0x28] ss:$16 sps:$4 sm:$0xff]   ;;  %v1056_v49 = vld [vmem:[#allocation5 + $0xc] ss:$16 sps:$4 sm:$0xff]   ;;  %v1087_v50 = vld [vmem:[#allocation5 + $0x160] ss:$16 sps:$4 sm:$0xff]  }
  0x3a   :  { %v1088_v51 = vld [vmem:[#allocation5 + $0x144] ss:$16 sps:$4 sm:$0xff]   ;;  %v1054_v52 = vld [vmem:[#allocation5 + $0x8] ss:$16 sps:$4 sm:$0xff]   ;;  %v1062_v53 = vld [vmem:[#allocation5 + $0x1ec] ss:$16 sps:$4 sm:$0xff]  }
  0x3b   :  { %978 = vmatpush3.bf16.msra.mxu0 %v1006_v8  ;;  %v1093_v54 = vld [vmem:[#allocation5 + $0x140] ss:$16 sps:$4 sm:$0xff]   ;;  %v1094_v55 = vld [vmem:[#allocation5 + $0x124] ss:$16 sps:$4 sm:$0xff]   ;;  %v1060_v56 = vld [vmem:[#allocation5 + $0x1e8] ss:$16 sps:$4 sm:$0xff]  }
  0x3c   :  { %979 = vmatprep.subr.bf16.mxu0 %v1235_v0  ;;  %604 = vmatpush1.bf16.msra.mxu1 %v1039_v17  ;;  %v1068_v57 = vld [vmem:[#allocation5 + $0x1cc] ss:$16 sps:$4 sm:$0xff]   ;;  %v1066_v58 = vld [vmem:[#allocation5 + $0x1c8] ss:$16 sps:$4 sm:$0xff]   ;;  %v1099_v5 = vld [vmem:[#allocation5 + $0x120] ss:$16 sps:$4 sm:$0xff]  }
  0x3d   :  { %605 = vmatprep.subr.bf16.mxu1 %v1040_v18  ;;  %v1074_v59 = vld [vmem:[#allocation5 + $0x1ac] ss:$16 sps:$4 sm:$0xff]   ;;  %v1072_v60 = vld [vmem:[#allocation5 + $0x1a8] ss:$16 sps:$4 sm:$0xff]   ;;  %v1100_v6 = vld [vmem:[#allocation5 + $0x104] ss:$16 sps:$4 sm:$0xff]  }
  0x3e   :  { %v1080_v61 = vld [vmem:[#allocation5 + $0x18c] ss:$16 sps:$4 sm:$0xff]   ;;  %v1078_v62 = vld [vmem:[#allocation5 + $0x188] ss:$16 sps:$4 sm:$0xff]   ;;  %v1105_v9 = vld [vmem:[#allocation5 + $0x100] ss:$16 sps:$4 sm:$0xff]  }
  0x3f   :  { %980 = vmatpush3.bf16.msra.mxu0 %v1007_v13  ;;  %v1086_v63 = vld [vmem:[#allocation5 + $0x16c] ss:$16 sps:$4 sm:$0xff]   ;;  %v1090_v2 = vld [vmem:[#allocation5 + $0x148] ss:$16 sps:$4 sm:$0xff]   ;;  %v1304_v10 = vld [vmem:[%s1328_s1] sm:$0xf] }
  0x40   :  { %981 = vmatprep.subr.bf16.mxu0 %v1235_v0  ;;  %606 = vmatpush1.bf16.msra.mxu1 %v1045_v21  ;;  %v1092_v1 = vld [vmem:[#allocation5 + $0x14c] ss:$16 sps:$4 sm:$0xff]   ;;  %v1096_v4 = vld [vmem:[#allocation5 + $0x128] ss:$16 sps:$4 sm:$0xff]   ;;  %v869_v11 = vld [vmem:[%s1330_s3] ss:$0 sm:$0xff] }
  0x41   :  { %607 = vmatprep.subr.bf16.mxu1 %v1046_v23  ;;  %v1098_v3 = vld [vmem:[#allocation5 + $0x12c] ss:$16 sps:$4 sm:$0xff]   ;;  %v1102_v8 = vld [vmem:[#allocation5 + $0x108] ss:$16 sps:$4 sm:$0xff]   ;;  %627 = vmatprep.mubr.bf16.mxu1 %v1304_v10 }
  0x42   :  { %v1104_v7 = vld [vmem:[#allocation5 + $0x10c] ss:$16 sps:$4 sm:$0xff]  }
  0x43   :  { %982 = vmatpush3.bf16.msra.mxu0 %v1008_v16  ;;  %v1111_v21 = vld [vmem:[#allocation7 + $0x64] ss:$8 sps:$4 sm:$0xff]   ;;  %v1114_v23 = vld [vmem:[#allocation7 + $0x54] ss:$8 sps:$4 sm:$0xff]  }
  0x44   :  { %983 = vmatprep.subr.bf16.mxu0 %v1235_v0  ;;  %608 = vmatpush1.bf16.msra.mxu1 %v1051_v26  ;;  %v1084_v0 = vld [vmem:[#allocation5 + $0x168] ss:$16 sps:$4 sm:$0xff]   ;;  %v1117_v26 = vld [vmem:[#allocation7 + $0x44] ss:$8 sps:$4 sm:$0xff]  }
  0x45   :  { %609 = vmatprep.subr.bf16.mxu1 %v1052_v27  ;;  %v1120_v27 = vld [vmem:[#allocation7 + $0x34] ss:$8 sps:$4 sm:$0xff]  }
  0x47   :  { %984 = vmatpush3.bf16.msra.mxu0 %v1009_v19  ;;  %v1108_v19 = vld [vmem:[#allocation7 + $0x74] ss:$8 sps:$4 sm:$0xff]  }
  0x48   :  { %636 = vmatprep.subr.bf16.mxu0 %v1014_v20  ;;  %610 = vmatpush1.bf16.msra.mxu1 %v1057_v30  ;;  %v1106_v20 = vld [vmem:[#allocation7 + $0x70] ss:$8 sps:$4 sm:$0xff]   ;;  %v1237_v30 = vmov 0  }
  0x49   :  { %611 = vmatprep.subr.bf16.mxu1 %v1058_v31  ;;  %v1121_v31 = vld [vmem:[#allocation7 + $0x20] ss:$8 sps:$4 sm:$0xff]  }
  0x4a   :  { %986 = vmatmul.mubr.bf16.vlgmr.msra.gmra.mxu0 %v74_v22  ;;  %v1109_v22 = vld [vmem:[#allocation7 + $0x60] ss:$8 sps:$4 sm:$0xff]  }
  0x4b   :  { %637 = vmatpush1.bf16.msra.mxu0 %v1012_v24  ;;  %668 = vmatprep.mubr.bf16.mxu0 %v1304_v10  ;;  %v1112_v24 = vld [vmem:[#allocation7 + $0x50] ss:$8 sps:$4 sm:$0xff]  }
  0x4c   :  { %638 = vmatprep.subr.bf16.mxu0 %v1020_v25  ;;  %612 = vmatpush2.bf16.msra.mxu1 %v1063_v34  ;;  %v1115_v25 = vld [vmem:[#allocation7 + $0x40] ss:$8 sps:$4 sm:$0xff]   ;;  %v1129_v34 = vld [vmem:[#allocation7 + $0x4] ss:$8 sps:$4 sm:$0xff]  }
  0x4d   :  { %613 = vmatprep.subr.bf16.mxu1 %v1064_v35  ;;  %v1127_v35 = vld [vmem:[#allocation7] ss:$8 sps:$4 sm:$0xff]  }
  0x4f   :  { %639 = vmatpush1.bf16.msra.mxu0 %v1018_v28  ;;  %v1118_v28 = vld [vmem:[#allocation7 + $0x30] ss:$8 sps:$4 sm:$0xff]  }
  0x50   :  { %640 = vmatprep.subr.bf16.mxu0 %v1026_v29  ;;  %614 = vmatpush2.bf16.msra.mxu1 %v1069_v38  ;;  %v1123_v29 = vld [vmem:[#allocation7 + $0x24] ss:$8 sps:$4 sm:$0xff]  }
  0x51   :  { %615 = vmatprep.subr.bf16.mxu1 %v1070_v39  ;;  %v253_v39 = vld [vmem:[%s1332_s5] sm:$0xf]  ;;  %s1238_s5 = smov [#allocation8]  }
  0x52   :  { %s857_s11 = sshll.u32 %s1238_s5, 4  ;;  %s858_s11 = int_to_ptr.vmem [resolvable:$true] %s857_s11 }
  0x53   :  { %641 = vmatpush1.bf16.msra.mxu0 %v1024_v32  ;;  %v1126_v32 = vld [vmem:[#allocation7 + $0x14] ss:$8 sps:$4 sm:$0xff]   ;;  %s1200_s12 = scalar_lea.vmem %s858_s11, 128  ;;  %p1205_p2 = scmp.lt.s32.totalorder %s858_s11, %s858_s11 }
  0x54   :  { %642 = vmatprep.subr.bf16.mxu0 %v1032_v33  ;;  %616 = vmatpush2.bf16.msra.mxu1 %v1075_v42  ;;  %v1124_v33 = vld [vmem:[#allocation7 + $0x10] ss:$8 sps:$4 sm:$0xff]   ;;  %p1201_p1 = scmp.ne.s32.totalorder %s858_s11, %s1200_s12  ;;  %p1206_p3 = scmp.lt.s32.totalorder %s1200_s12, %s1200_s12 }
  0x55   :  { %617 = vmatprep.subr.bf16.mxu1 %v1076_v44 }
  0x56   :  { %p1207_p4 = por %p1206_p3, %p1205_p2 }
  0x57   :  { %643 = vmatpush1.bf16.msra.mxu0 %v1030_v36  ;;  %v255_v36 = vlaneseq }
  0x58   :  { %644 = vmatprep.subr.bf16.mxu0 %v1038_v37  ;;  %618 = vmatpush2.bf16.msra.mxu1 %v1081_v46  ;;  %p1208_p5 = pnand %p1207_p4, %p1201_p1 }
  0x59   :  { %619 = vmatprep.subr.bf16.mxu1 %v1082_v47  ;;  %v256_v37 = vshrl.u32 %v255_v36, 7 }
  0x5b   :  { %645 = vmatpush1.bf16.msra.mxu0 %v1036_v40  ;;  %v257_v38 = vsub.s32 0, %v256_v37  ;;  %v261_v47 = vsub.s32 1, %v256_v37 }
  0x5c   :  { %646 = vmatprep.subr.bf16.mxu0 %v1044_v41  ;;  %620 = vmatpush2.bf16.msra.mxu1 %v1087_v50 }
  0x5d   :  { %621 = vmatprep.subr.bf16.mxu1 %v1088_v51  ;;  %v258_v40 = vrot.slane %v253_v39, %v257_v38 }
  0x5f   :  { %647 = vmatpush1.bf16.msra.mxu0 %v1042_v43 }
  0x60   :  { %648 = vmatprep.subr.bf16.mxu0 %v1050_v45  ;;  %622 = vmatpush2.bf16.msra.mxu1 %v1093_v54 }
  0x61   :  { %623 = vmatprep.subr.bf16.mxu1 %v1094_v55 }
  0x63   :  { %649 = vmatpush1.bf16.msra.mxu0 %v1048_v48 }
  0x64   :  { %650 = vmatprep.subr.bf16.mxu0 %v1056_v49  ;;  %624 = vmatpush2.bf16.msra.mxu1 %v1099_v5 }
  0x65   :  { %625 = vmatprep.subr.bf16.mxu1 %v1100_v6 }
  0x67   :  { %651 = vmatpush1.bf16.msra.mxu0 %v1054_v52  ;;  %v262_v52 = vrot.slane %v253_v39, %v261_v47 }
  0x68   :  { %652 = vmatprep.subr.bf16.mxu0 %v1062_v53  ;;  %626 = vmatpush2.bf16.msra.mxu1 %v1105_v9 }
  0x69   :  { %805 = vmatprep.subr.bf16.mxu1 %v1108_v19 }
  0x6b   :  { %653 = vmatpush2.bf16.msra.mxu0 %v1060_v56 }
  0x6c   :  { %654 = vmatprep.subr.bf16.mxu0 %v1068_v57  ;;  %v269_v57 = vsub.s32 3, %v256_v37 }
  0x6f   :  { %655 = vmatpush2.bf16.msra.mxu0 %v1066_v58  ;;  %v265_v58 = vsub.s32 2, %v256_v37 }
  0x70   :  { %656 = vmatprep.subr.bf16.mxu0 %v1074_v59  ;;  %v270_v59 = vrot.slane %v253_v39, %v269_v57 }
  0x73   :  { %657 = vmatpush2.bf16.msra.mxu0 %v1072_v60  ;;  %v266_v60 = vrot.slane %v253_v39, %v265_v58 }
  0x74   :  { %658 = vmatprep.subr.bf16.mxu0 %v1080_v61 }
  0x77   :  { %659 = vmatpush2.bf16.msra.mxu0 %v1078_v62 }
  0x78   :  { %660 = vmatprep.subr.bf16.mxu0 %v1086_v63 }
  0x7b   :  { %661 = vmatpush2.bf16.msra.mxu0 %v1084_v0 }
  0x7c   :  { %662 = vmatprep.subr.bf16.mxu0 %v1092_v1 }
  0x7f   :  { %663 = vmatpush2.bf16.msra.mxu0 %v1090_v2 }
  0x80   :  { %664 = vmatprep.subr.bf16.mxu0 %v1098_v3 }
  0x83   :  { %665 = vmatpush2.bf16.msra.mxu0 %v1096_v4  ;;  %v692_v4 = vunpack.c.l.bf16 %v1304_v10 }
  0x84   :  { %666 = vmatprep.subr.bf16.mxu0 %v1104_v7 }
  0x87   :  { %667 = vmatpush2.bf16.msra.mxu0 %v1102_v8 }
 0x10a   :  { %v181_v12 = vpop.f32.mrf.mxu0 }
 0x10b   :  { %v182_v13 = vadd.f32 %v869_v11, %v181_v12 }
 0x10c   :  { %v987_v14 = vpop.f32.mrf.mxu0 }
 0x10d   :  { %v187_v15 = vmax.f32 %v182_v13, 0.0 }
 0x10e   :  { %v184_v16 = vpop.f32.mrf.mxu0 }
 0x10f   :  { %v188_v17 = vpack.c.bf16 %v187_v15, %v187_v15 }
 0x110   :  { %v988_v18 = vpop.f32.mrf.mxu0 }
 0x111   :  { %628 = vmatmul.mubr.bf16.vlgmr.msra.gmra.mxu1 %v188_v17  ;;  %669 = vmatmul.mubr.bf16.vlgmr.msra.gmra.mxu0 %v188_v17 }
 0x112   :  { %806 = vmatpush1.bf16.msra.mxu1 %v1106_v20  ;;  %837 = vmatprep.mubr.bf16.mxu1 %v1237_v30 }
 0x113   :  { %807 = vmatprep.subr.bf16.mxu1 %v1111_v21 }
 0x116   :  { %808 = vmatpush1.bf16.msra.mxu1 %v1109_v22 }
 0x117   :  { %809 = vmatprep.subr.bf16.mxu1 %v1114_v23 }
 0x11a   :  { %810 = vmatpush1.bf16.msra.mxu1 %v1112_v24 }
 0x11b   :  { %811 = vmatprep.subr.bf16.mxu1 %v1117_v26 }
 0x11e   :  { %812 = vmatpush1.bf16.msra.mxu1 %v1115_v25 }
 0x11f   :  { %813 = vmatprep.subr.bf16.mxu1 %v1120_v27 }
 0x122   :  { %814 = vmatpush1.bf16.msra.mxu1 %v1118_v28 }
 0x123   :  { %815 = vmatprep.subr.bf16.mxu1 %v1123_v29 }
 0x126   :  { %816 = vmatpush1.bf16.msra.mxu1 %v1121_v31 }
 0x127   :  { %817 = vmatprep.subr.bf16.mxu1 %v1126_v32 }
 0x12a   :  { %818 = vmatpush1.bf16.msra.mxu1 %v1124_v33 }
 0x12b   :  { %819 = vmatprep.subr.bf16.mxu1 %v1129_v34 }
 0x12e   :  { %820 = vmatpush1.bf16.msra.mxu1 %v1127_v35 }
 0x1d1   :  { %v629_v41 = vpop.f32.mrf.mxu1  ;;  %v670_v42 = vpop.f32.mrf.mxu0 }
 0x1d2   :  { %v630_v43 = vadd.f32 %v629_v41, %v258_v40  ;;  %v671_v0 = vadd.f32 %v670_v42, %v266_v60 }
 0x1d3   :  { %v631_v44 = vpop.f32.mrf.mxu1  ;;  %v672_v45 = vpop.f32.mrf.mxu0 }
 0x1d4   :  { %v942_v46 = vmul.f32 -1.442695, %v630_v43  ;;  %v632_v53 = vadd.f32 %v631_v44, %v262_v52  ;;  %v673_v62 = vadd.f32 %v672_v45, %v270_v59 }
 0x1d5   :  { %v633_v48 = vpop.f32.mrf.mxu1  ;;  %v674_v49 = vpop.f32.mrf.mxu0 }
 0x1d6   :  { %1130 = vpow2.f32 %v942_v46  ;;  %v943_v54 = vmul.f32 -1.442695, %v632_v53 }
 0x1d7   :  { %v634_v50 = vpop.f32.mrf.mxu1  ;;  %v675_v51 = vpop.f32.mrf.mxu0 }
 0x1d8   :  { %1132 = vpow2.f32 %v943_v54 }
 0x1e3   :  { %v1131_v55 = vpop.eup %1130 }
 0x1e4   :  { %v680_v56 = vadd.f32 1.0, %v1131_v55 }
 0x1e5   :  { %v1133_v61 = vpop.eup %1132 }
 0x1e6   :  { %1134 = vrcp.f32 %v680_v56  ;;  %v686_v2 = vadd.f32 1.0, %v1133_v61 }
 0x1f3   :  { %v1135_v63 = vpop.eup %1134 }
 0x1f4   :  { %v689_v1 = vmul.f32 %v1135_v63, %v673_v62 }
 0x1f6   :  { %v690_v3 = vadd.f32 %v689_v1, %v671_v0 }
 0x1f8   :  { %1136 = vtanh.f32 %v690_v3 }
 0x1f9   :  { %1138 = vrcp.f32 %v686_v2 }
 0x205   :  { %v1137_v5 = vpop.eup %1136 }
 0x206   :  { %v693_v6 = vsub.f32 %v692_v4, %v1137_v5  ;;  %v1139_v7 = vpop.eup %1138 }
 0x208   :  { %v694_v8 = vmul.f32 %v1139_v7, %v693_v6 }
 0x20a   :  { %v695_v9 = vadd.f32 %v1137_v5, %v694_v8 }
 0x20c   :  { %v696_v11 = vpack.c.bf16 %v695_v9, %v695_v9  ;;  %848 = vst [vmem:[#allocation8] sm:$0xff] %v695_v9 }
 0x20e   :  { %838 = vmatmul.mubr.bf16.vlgmr.msra.gmra.mxu1 %v696_v11 }
 0x20f   :  { %1211 = shalt.err (!%p1208_p5)
}
 0x210   :  { %860 = dma.vmem_to_hbm [thread:$0]  %s858_s11, 128, %s1336_s9, [#allocation4]   ;;  %v713_v10 = vld [vmem:[%s1334_s7] sm:$0x3] }
 0x211   :  { %v718_v12 = vrot.slane %v713_v10, %v257_v38  ;;  %v722_v13 = vrot.slane %v713_v10, %v261_v47 }
 0x2ce   :  { %v839_v14 = vpop.f32.mrf.mxu1 }
 0x2cf   :  { %v840_v15 = vadd.f32 %v839_v14, %v718_v12 }
 0x2d0   :  { %v841_v16 = vpop.f32.mrf.mxu1 }
 0x2d1   :  { %846 = vst [vmem:[%s1335_s8] sm:$0xff] %v840_v15  ;;  %v842_v17 = vadd.f32 %v841_v16, %v722_v13 }
 0x2d2   :  { %v843_v18 = vpop.f32.mrf.mxu1 }
 0x2d3   :  { %847 = vst [vmem:[%s1335_s8 + $0x8] sm:$0xff] %v842_v17 }
 0x2d4   :  { %v844_v19 = vpop.f32.mrf.mxu1 }
 0x2d5   :  { %1224 = dma.done.wait [#allocation4], 128  }
 0x2d6   :  { %1225 = vsyncadd [#allocation4], 4294967168 }
 0x2d7   :  { %866 = vsyncpa [#allocation3], 1 }
 0x2d8   :  { %867 = vsyncpa [#allocation6], 1 }
 0x2d9   :  { %868 = vsyncpa [#allocation4], 1 }

</bundles_post_ra>
